<compile_context>
chip_gen: v6e
topology: v6e:2x2x1
jax: 0.10.0
libtpu: 0.0.40
codegen_flags: <defaults>
</compile_context>

<pallas_src>
import functools

import jax
import jax.numpy as jnp
from jax.experimental import pallas as pl
from jax.experimental.pallas import tpu as pltpu


def _round_up(x, m):
    return ((x + m - 1) // m) * m


def _mlp_kernel(n_layers, activation, x_ref, *refs):
    """Fused MLP over one batch tile, entirely in (features, batch) form.

    x_ref:  (in_dim, TB)   -- input transposed, batch on the lane axis.
    refs:   (w0, b0, w1, b1, ..., w_{L-1}, b_{L-1}, out_ref) where every
            w_i is (n_out, n_in) and every b_i is (n_out, 1).
    out_ref: (1, TB)       -- lane-dense output, batch on the lane axis.
    """
    out_ref = refs[-1]
    p = refs[:-1]
    w = lambda i: p[2 * i][...].astype(jnp.float32)
    b = lambda i: p[2 * i + 1][...].astype(jnp.float32)

    hT = x_ref[...].astype(jnp.float32)                          # (in_dim, TB)
    for i in range(n_layers):
        # (n_out, n_in) @ (n_in, TB) -> (n_out, TB): lane-dense N=TB MXU
        # output, lane-dense bias-add / tanh regardless of hidden width.
        hT = jnp.dot(w(i), hT, preferred_element_type=jnp.float32) + b(i)
        if i < n_layers - 1:
            hT = activation(hT)
    out_ref[...] = hT.astype(out_ref.dtype)


def mlp_forward(x, params, *, activation=jnp.tanh, max_batch_tile=4096):
    """x: (B, 3) float32.  params: list of (W (n_in, n_out), b (1, n_out))."""
    B, in_dim = x.shape
    n_layers = len(params)
    out_dim = params[-1][0].shape[1]
    assert out_dim == 1, "NN module always ends in a width-1 Linear"

    # --- adaptive batch tile -------------------------------------------------
    # Lane-aligned; large enough to amortize the ~0.35us/step grid overhead;
    # small-batch clamp avoids redundant compute; >=2 tiles when possible so
    # v7x's two TensorCores both get work via the "parallel" grid axis.
    b_aligned = _round_up(B, 128)
    batch_tile = min(max_batch_tile, b_aligned)
    if b_aligned >= 256:
        batch_tile = min(batch_tile, _round_up((b_aligned + 1) // 2, 128))
    n_tiles = pl.cdiv(B, batch_tile)
    B_pad = n_tiles * batch_tile

    # Transpose first, then pad only the lane axis of the small (3, B) layout.
    xT = x.T                                                    # (in_dim, B)
    if B_pad != B:
        xT = jnp.pad(xT, ((0, 0), (0, B_pad - B)))              # (in_dim, B_pad)

    # Re-layout the (small) parameters: every weight (n_out, n_in), every bias
    # (n_out, 1).  Full-array VMEM blocks, constant block index -> resident.
    flat_params = []
    in_specs = [pl.BlockSpec((in_dim, batch_tile), lambda i: (0, i))]
    for wgt, bias in params:
        wk = wgt.T                                              # (n_out, n_in)
        bk = bias.reshape(-1, 1)                                # (n_out, 1)
        flat_params.extend([wk, bk])
        in_specs.append(pl.BlockSpec(wk.shape, lambda i: (0, 0)))
        in_specs.append(pl.BlockSpec(bk.shape, lambda i: (0, 0)))

    # Advisory cost hint for XLA's scheduler.
    flops = sum(2 * B_pad * wgt.shape[0] * wgt.shape[1] for wgt, _ in params)
    transcendentals = B_pad * sum(wgt.shape[1] for wgt, _ in params[:-1])
    bytes_accessed = (4 * B_pad * (in_dim + out_dim)
                      + sum(4 * (wgt.size + bias.size) for wgt, bias in params))
    cost = pl.CostEstimate(flops=flops, transcendentals=transcendentals,
                           bytes_accessed=bytes_accessed)

    kernel = functools.partial(_mlp_kernel, n_layers, activation)

    out_t = pl.pallas_call(
        kernel,
        out_shape=jax.ShapeDtypeStruct((1, B_pad), x.dtype),
        grid=(n_tiles,),
        in_specs=in_specs,
        out_specs=pl.BlockSpec((1, batch_tile), lambda i: (0, i)),
        compiler_params=pltpu.CompilerParams(
            dimension_semantics=("parallel",),
            vmem_limit_bytes=32 * 1024 * 1024),
        cost_estimate=cost,
    )(xT, *flat_params)

    return out_t[0, :B].reshape(B, out_dim)


def init_params(key, num_layers, num_nodes):
    """PyTorch-style Linear init: U(-1/sqrt(fan_in), 1/sqrt(fan_in))."""
    sizes = [3] + [num_nodes] * num_layers + [1]
    params = []
    for n_in, n_out in zip(sizes[:-1], sizes[1:]):
        key, kw, kb = jax.random.split(key, 3)
        bound = 1.0 / jnp.sqrt(jnp.float32(n_in))
        w = jax.random.uniform(kw, (n_in, n_out), jnp.float32, -bound, bound)
        b = jax.random.uniform(kb, (1, n_out), jnp.float32, -bound, bound)
        params.append((w, b))
    return params


def mlp_reference(x, params, activation=jnp.tanh):
    h = x
    for i, (w, b) in enumerate(params):
        h = h @ w + b
        if i < len(params) - 1:
            h = activation(h)
    return h


if __name__ == "__main__":
    num_layers = 2      # hidden layers
    num_nodes = 32      # hidden width
    activation = jnp.tanh   # torch.nn.Tanh equivalent

    key = jax.random.PRNGKey(0)
    key, kx = jax.random.split(key)
    params = init_params(key, num_layers, num_nodes)

    # Small batch consistent with the module's toy usage (single 128 tile).
    x_small = jax.random.normal(kx, (8, 3), jnp.float32)
    out_small = jax.block_until_ready(
        mlp_forward(x_small, params, activation=activation))
    ref_small = mlp_reference(x_small, params, activation)
    assert out_small.shape == (8, 1), out_small.shape
    assert jnp.allclose(out_small, ref_small, atol=1e-4, rtol=1e-4), \
        "mismatch vs reference (small batch)"

    # Non-tile-aligned batch: exercises padding + multi-tile (2-tile) grid.
    key, kx2 = jax.random.split(key)
    x_big = jax.random.normal(kx2, (1000, 3), jnp.float32)
    out_big = jax.block_until_ready(
        mlp_forward(x_big, params, activation=activation))
    ref_big = mlp_reference(x_big, params, activation)
    assert out_big.shape == (1000, 1), out_big.shape
    assert jnp.allclose(out_big, ref_big, atol=1e-4, rtol=1e-4), \
        "mismatch vs reference (padded batch)"

    print("KERNEL_OK")
</pallas_src>

<mosaic_0001>
module attributes {stable_mosaic.version = 11 : i64} {
  func.func @_mlp_kernel(%arg0: i32, %arg1: memref<3x128xf32, #tpu.memory_space<vmem>>, %arg2: memref<32x3xf32, #tpu.memory_space<vmem>>, %arg3: memref<32x1xf32, #tpu.memory_space<vmem>>, %arg4: memref<32x32xf32, #tpu.memory_space<vmem>>, %arg5: memref<32x1xf32, #tpu.memory_space<vmem>>, %arg6: memref<1x32xf32, #tpu.memory_space<vmem>>, %arg7: memref<1x1xf32, #tpu.memory_space<vmem>>, %arg8: memref<1x128xf32, #tpu.memory_space<vmem>>) attributes {dimension_semantics = [#tpu.dimension_semantics<parallel>], iteration_bounds = array<i64: 1>, scalar_prefetch = 0 : i64, scratch_operands = 0 : i64, tpu.core_type = #tpu.core_type<tc>, window_params = [{transform_indices = @transform_0, window_bounds = array<i64: 3, 128>}, {pipeline_mode = #tpu.pipeline_mode<synchronous>, transform_indices = @transform_1, window_bounds = array<i64: 32, 3>}, {pipeline_mode = #tpu.pipeline_mode<synchronous>, transform_indices = @transform_2, window_bounds = array<i64: 32, 1>}, {pipeline_mode = #tpu.pipeline_mode<synchronous>, transform_indices = @transform_3, window_bounds = array<i64: 32, 32>}, {pipeline_mode = #tpu.pipeline_mode<synchronous>, transform_indices = @transform_4, window_bounds = array<i64: 32, 1>}, {pipeline_mode = #tpu.pipeline_mode<synchronous>, transform_indices = @transform_5, window_bounds = array<i64: 1, 32>}, {pipeline_mode = #tpu.pipeline_mode<synchronous>, transform_indices = @transform_6, window_bounds = array<i64: 1, 1>}, {transform_indices = @transform_7, window_bounds = array<i64: 1, 128>}]} {
    %c0 = arith.constant 0 : index
    %c0_0 = arith.constant 0 : index
    %0 = vector.load %arg1[%c0, %c0_0] : memref<3x128xf32, #tpu.memory_space<vmem>>, vector<3x128xf32>
    %c0_1 = arith.constant 0 : index
    %c0_2 = arith.constant 0 : index
    %1 = vector.load %arg2[%c0_1, %c0_2] : memref<32x3xf32, #tpu.memory_space<vmem>>, vector<32x3xf32>
    %cst = arith.constant dense<0.000000e+00> : vector<32x128xf32>
    %2 = tpu.matmul %1, %0, %cst {dimension_numbers = #tpu.dot_dimension_numbers<[1], [0], [0], [1], [0, 0, 1, 1], [], []>} : vector<32x3xf32>, vector<3x128xf32>, vector<32x128xf32> -> vector<32x128xf32>
    %c0_3 = arith.constant 0 : index
    %c0_4 = arith.constant 0 : index
    %3 = vector.load %arg3[%c0_3, %c0_4] : memref<32x1xf32, #tpu.memory_space<vmem>>, vector<32x1xf32>
    %4 = vector.broadcast %3 : vector<32x1xf32> to vector<32x128xf32>
    %5 = arith.addf %2, %4 : vector<32x128xf32>
    %6 = math.tanh %5 : vector<32x128xf32>
    %c0_5 = arith.constant 0 : index
    %c0_6 = arith.constant 0 : index
    %7 = vector.load %arg4[%c0_5, %c0_6] : memref<32x32xf32, #tpu.memory_space<vmem>>, vector<32x32xf32>
    %cst_7 = arith.constant dense<0.000000e+00> : vector<32x128xf32>
    %8 = tpu.matmul %7, %6, %cst_7 {dimension_numbers = #tpu.dot_dimension_numbers<[1], [0], [0], [1], [0, 0, 1, 1], [], []>} : vector<32x32xf32>, vector<32x128xf32>, vector<32x128xf32> -> vector<32x128xf32>
    %c0_8 = arith.constant 0 : index
    %c0_9 = arith.constant 0 : index
    %9 = vector.load %arg5[%c0_8, %c0_9] : memref<32x1xf32, #tpu.memory_space<vmem>>, vector<32x1xf32>
    %10 = vector.broadcast %9 : vector<32x1xf32> to vector<32x128xf32>
    %11 = arith.addf %8, %10 : vector<32x128xf32>
    %12 = math.tanh %11 : vector<32x128xf32>
    %c0_10 = arith.constant 0 : index
    %c0_11 = arith.constant 0 : index
    %13 = vector.load %arg6[%c0_10, %c0_11] : memref<1x32xf32, #tpu.memory_space<vmem>>, vector<1x32xf32>
    %cst_12 = arith.constant dense<0.000000e+00> : vector<1x128xf32>
    %14 = tpu.matmul %13, %12, %cst_12 {dimension_numbers = #tpu.dot_dimension_numbers<[1], [0], [0], [1], [0, 0, 1, 1], [], []>} : vector<1x32xf32>, vector<32x128xf32>, vector<1x128xf32> -> vector<1x128xf32>
    %c0_13 = arith.constant 0 : index
    %c0_14 = arith.constant 0 : index
    %15 = vector.load %arg7[%c0_13, %c0_14] : memref<1x1xf32, #tpu.memory_space<vmem>>, vector<1x1xf32>
    %16 = vector.broadcast %15 : vector<1x1xf32> to vector<1x128xf32>
    %17 = arith.addf %14, %16 : vector<1x128xf32>
    %c0_15 = arith.constant 0 : index
    %c0_16 = arith.constant 0 : index
    %18 = vector.load %arg8[%c0_15, %c0_16] : memref<1x128xf32, #tpu.memory_space<vmem>>, vector<1x128xf32>
    tpu.vector_store %arg8[%c0_15, %c0_16], %17 {strides = array<i32>} : memref<1x128xf32, #tpu.memory_space<vmem>>, vector<1x128xf32>,
    return
  }
  func.func @transform_0(%arg0: i32) -> (i32, i32) {
    %c0_i32 = arith.constant 0 : i32
    %c0_i32_0 = arith.constant 0 : i32
    return %c0_i32, %arg0 : i32, i32
  }
  func.func @transform_1(%arg0: i32) -> (i32, i32) {
    %c0_i32 = arith.constant 0 : i32
    %c0_i32_0 = arith.constant 0 : i32
    %c0_i32_1 = arith.constant 0 : i32
    return %c0_i32, %c0_i32_0 : i32, i32
  }
  func.func @transform_2(%arg0: i32) -> (i32, i32) {
    %c0_i32 = arith.constant 0 : i32
    %c0_i32_0 = arith.constant 0 : i32
    %c0_i32_1 = arith.constant 0 : i32
    return %c0_i32, %c0_i32_0 : i32, i32
  }
  func.func @transform_3(%arg0: i32) -> (i32, i32) {
    %c0_i32 = arith.constant 0 : i32
    %c0_i32_0 = arith.constant 0 : i32
    %c0_i32_1 = arith.constant 0 : i32
    return %c0_i32, %c0_i32_0 : i32, i32
  }
  func.func @transform_4(%arg0: i32) -> (i32, i32) {
    %c0_i32 = arith.constant 0 : i32
    %c0_i32_0 = arith.constant 0 : i32
    %c0_i32_1 = arith.constant 0 : i32
    return %c0_i32, %c0_i32_0 : i32, i32
  }
  func.func @transform_5(%arg0: i32) -> (i32, i32) {
    %c0_i32 = arith.constant 0 : i32
    %c0_i32_0 = arith.constant 0 : i32
    %c0_i32_1 = arith.constant 0 : i32
    return %c0_i32, %c0_i32_0 : i32, i32
  }
  func.func @transform_6(%arg0: i32) -> (i32, i32) {
    %c0_i32 = arith.constant 0 : i32
    %c0_i32_0 = arith.constant 0 : i32
    %c0_i32_1 = arith.constant 0 : i32
    return %c0_i32, %c0_i32_0 : i32, i32
  }
  func.func @transform_7(%arg0: i32) -> (i32, i32) {
    %c0_i32 = arith.constant 0 : i32
    %c0_i32_0 = arith.constant 0 : i32
    return %c0_i32, %arg0 : i32, i32
  }
}

</mosaic_0001>

<bundles_post_ra>
// kernel: tpu_custom_call.1
= control target key start
LH: loop header
LB: loop body
LE: loop exit
PB: predicated region body
PF: predicated region fallthrough
CT: control target
= control target key end

     0   :  { %s611_s0 = inlined_call_operand.vmem [shape: f32[3,128], index: 0, kind: input, shape index: {}]   ;;  %s612_s1 = inlined_call_operand.vmem [shape: f32[32,3], index: 1, kind: input, shape index: {}]   ;;  %s613_s2 = inlined_call_operand.vmem [shape: f32[32,1], index: 2, kind: input, shape index: {}]   ;;  %s614_s3 = inlined_call_operand.vmem [shape: f32[32,32], index: 3, kind: input, shape index: {}]   ;;  %s615_s4 = inlined_call_operand.vmem [shape: f32[32,1], index: 4, kind: input, shape index: {}]   ;;  %s616_s5 = inlined_call_operand.vmem [shape: f32[1,32], index: 5, kind: input, shape index: {}]   ;;  %s617_s6 = inlined_call_operand.<no memory space> [shape: f32[1,1], index: 6, kind: input, shape index: {}]   ;;  %s618_s7 = inlined_call_operand.hbm [shape: f32[1,128], index: 7, kind: output, shape index: {}]  }
   0x1   :  { %v12_v0 = vstv %s617_s6 }
   0x2   :  { %13 = vst [vmem:[#allocation2] sm:$0x1] %v12_v0 }
   0x3   :  { %v29_v1 = vld [vmem:[%s611_s0] sm:$0x7]  ;;  %vm71_vm0 = vcmask 1042432   ;;  %vm58_vm1 = vcmask 23552   ;;  %v31_v3 = vld [vmem:[%s612_s1 + $0x8] sm:$0xff]  ;;  %v32_v4 = vld [vmem:[%s612_s1 + $0x10] sm:$0xff] }
   0x4   :  { %v30_v2 = vld [vmem:[%s612_s1] sm:$0xff]  ;;  %421 = vmatprep.subr.msk.mxu0 %vm71_vm0, %v29_v1  ;;  %v37_v5 = vld [vmem:[%s613_s2 + $0x18] sm:$0xff]  ;;  %v498_v6 = vmov 0   ;;  %v35_v7 = vld [vmem:[%s613_s2 + $0x8] sm:$0xff] }
   0x5   :  { %423 = vmatprep.mubr.msk.f32.mxu0 %vm58_vm1, %v30_v2  ;;  %422 = vmatpush3.msk.msra.mxu0 %vm71_vm0, %v29_v1  ;;  %v33_v8 = vld [vmem:[%s612_s1 + $0x18] sm:$0xff]  ;;  %v36_v9 = vld [vmem:[%s613_s2 + $0x10] sm:$0xff] }
   0x6   :  { %458 = vset.pattern.permute.xlu0 %v498_v6  ;;  %424 = vmatmul.mubr.msk.f32.vlgmr.msra.gmra.mxu0 %vm58_vm1, %v31_v3 }
   0x7   :  { %55 = vperm.xlu0 %458, %v37_v5   ;;  %426 = vmatprep.mubr.msk.f32.mxu0 %vm58_vm1, %v32_v4 }
   0x8   :  { %459 = vset.pattern.permute.xlu1 %v498_v6 }
   0x9   :  { %14 = vsyncpa [#allocation4], 0  ;;  %45 = vperm.xlu1 %459, %v35_v7   ;;  %v34_v10 = vld [vmem:[%s613_s2] sm:$0xff]  ;;  %v171_v11 = vld [vmem:[%s615_s4 + $0x18] sm:$0xff]  ;;  %vm192_vm2 = vcmask 261120   ;;  %v499_v36 = vmov 0.0   ;;  %v301_v54 = vlaneseq }
   0xa   :  { %427 = vmatmul.mubr.msk.f32.gmra.mxu0 %vm58_vm1, %v33_v8  ;;  %v170_v12 = vld [vmem:[%s615_s4 + $0x10] sm:$0xff]  ;;  %v169_v13 = vld [vmem:[%s615_s4 + $0x8] sm:$0xff]  ;;  %v168_v14 = vld [vmem:[%s615_s4] sm:$0xff]  ;;  %443 = vmatprep.subr.mxu0 %v499_v36  ;;  %vm500_vm3 = vmmov 0   ;;  %s501_s6 = smov [#allocation3]  }
   0xb   :  { %50 = vperm.xlu0 %458, %v36_v9   ;;  %v295_v15 = vld [vmem:[#allocation2] sm:$0x1]  ;;  %v165_v33 = vld [vmem:[%s614_s3 + $0x8] sm:$0xff]  ;;  %v166_v34 = vld [vmem:[%s614_s3 + $0x10] sm:$0xff]  ;;  %451 = vmatprep.mubr.msk.f32.mxu0 %vm500_vm3, %v499_v36  ;;  %v302_v55 = vshrl.u32 %v301_v54, 7  ;;  %s385_s10 = sshll.u32 %s501_s6, 4  ;;  %s386_s10 = int_to_ptr.vmem [resolvable:$true] %s385_s10 }
   0xc   :  { %v164_v16 = vld [vmem:[%s614_s3] sm:$0xff]  ;;  %v167_v35 = vld [vmem:[%s614_s3 + $0x18] sm:$0xff]  ;;  %s476_s11 = scalar_lea.vmem %s386_s10, 16  ;;  %p481_p1 = scmp.lt.s32.totalorder %s386_s10, %s386_s10 }
   0xd   :  { %40 = vperm.xlu1 %459, %v34_v10   ;;  %437 = vmatprep.mubr.msk.f32.mxu1 %vm192_vm2, %v164_v16  ;;  %v294_v52 = vld [vmem:[%s616_s5] sm:$0x1]  ;;  %v303_v56 = vsub.s32 0, %v302_v55  ;;  %p477_p0 = scmp.ne.s32.totalorder %s386_s10, %s476_s11  ;;  %s480_s5 = scalar_lea.vmem %s386_s10, 32 }
   0xe   :  { %p482_p2 = scmp.lt.s32.totalorder %s480_s5, %s476_s11 }
   0xf   :  { %189 = vperm.xlu0 %458, %v171_v11  }
  0x10   :  { %p483_p3 = por %p482_p2, %p481_p1 }
  0x11   :  { %184 = vperm.xlu1 %459, %v170_v12  }
  0x12   :  { %p484_p4 = pnand %p483_p3, %p477_p0 }
  0x13   :  { %179 = vperm.xlu0 %458, %v169_v13  }
  0x15   :  { %174 = vperm.xlu1 %459, %v168_v14  }
  0x17   :  { %298 = vperm.xlu0 %458, %v295_v15  }
  0x82   :  { %v56_v17 = vpop.permute.xlu0 %55 }
  0x84   :  { %v46_v19 = vpop.permute.xlu1 %45 }
  0x86   :  { %v51_v23 = vpop.permute.xlu0 %50 }
  0x88   :  { %v41_v27 = vpop.permute.xlu1 %40 }
  0x8a   :  { %v190_v37 = vpop.permute.xlu0 %189 }
  0x8c   :  { %v185_v39 = vpop.permute.xlu1 %184 }
  0x8e   :  { %v180_v43 = vpop.permute.xlu0 %179 }
  0x90   :  { %v175_v47 = vpop.permute.xlu1 %174 }
  0x92   :  { %v299_v57 = vpop.permute.xlu0 %298 }
  0x93   :  { %v304_v58 = vrot.slane %v299_v57, %v303_v56 }
  0xc6   :  { %v425_v18 = vpop.f32.mrf.mxu0 }
  0xc7   :  { %v147_v25 = vadd.f32 %v425_v18, %v46_v19 }
  0xc8   :  { %v141_v20 = vpop.f32.mrf.mxu0 }
  0xc9   :  { %v142_v28 = vadd.f32 %v141_v20, %v41_v27 }
  0xca   :  { %v428_v21 = vpop.f32.mrf.mxu0 }
  0xcb   :  { %v157_v22 = vadd.f32 %v428_v21, %v56_v17 }
  0xcc   :  { %v151_v24 = vpop.f32.mrf.mxu0 }
  0xcd   :  { %460 = vtanh.f32 %v157_v22  ;;  %v152_v26 = vadd.f32 %v151_v24, %v51_v23 }
  0xcf   :  { %462 = vtanh.f32 %v152_v26 }
  0xd0   :  { %464 = vtanh.f32 %v147_v25 }
  0xd1   :  { %466 = vtanh.f32 %v142_v28 }
  0xda   :  { %v461_v29 = vpop.eup %460 }
  0xdb   :  { %429 = vmatprep.subr.mxu1 %v461_v29 }
  0xdc   :  { %v463_v30 = vpop.eup %462  ;;  %430 = vmatpush3.msra.mxu1 %v461_v29 }
  0xdd   :  { %431 = vmatprep.subr.mxu1 %v463_v30  ;;  %v465_v31 = vpop.eup %464 }
  0xde   :  { %432 = vmatpush3.msra.mxu1 %v463_v30  ;;  %v467_v32 = vpop.eup %466 }
  0xdf   :  { %433 = vmatprep.subr.mxu1 %v465_v31 }
  0xe0   :  { %434 = vmatpush3.msra.mxu1 %v465_v31 }
  0xe1   :  { %435 = vmatprep.subr.mxu1 %v467_v32 }
  0xe2   :  { %436 = vmatpush3.msra.mxu1 %v467_v32 }
  0xe3   :  { %438 = vmatmul.mubr.msk.f32.vlgmr.msra.gmra.mxu1 %vm192_vm2, %v165_v33 }
  0xe4   :  { %440 = vmatprep.mubr.msk.f32.mxu1 %vm192_vm2, %v166_v34 }
  0xe7   :  { %441 = vmatmul.mubr.msk.f32.gmra.mxu1 %vm192_vm2, %v167_v35 }
 0x1a3   :  { %v439_v38 = vpop.f32.mrf.mxu1 }
 0x1a4   :  { %v277_v45 = vadd.f32 %v439_v38, %v180_v43 }
 0x1a5   :  { %v271_v40 = vpop.f32.mrf.mxu1 }
 0x1a6   :  { %v272_v48 = vadd.f32 %v271_v40, %v175_v47 }
 0x1a7   :  { %v442_v41 = vpop.f32.mrf.mxu1 }
 0x1a8   :  { %v287_v42 = vadd.f32 %v442_v41, %v190_v37 }
 0x1a9   :  { %v281_v44 = vpop.f32.mrf.mxu1 }
 0x1aa   :  { %468 = vtanh.f32 %v287_v42  ;;  %v282_v46 = vadd.f32 %v281_v44, %v185_v39 }
 0x1ac   :  { %470 = vtanh.f32 %v282_v46 }
 0x1ad   :  { %472 = vtanh.f32 %v277_v45 }
 0x1ae   :  { %474 = vtanh.f32 %v272_v48 }
 0x1b7   :  { %v469_v49 = vpop.eup %468 }
 0x1b8   :  { %444 = vmatpush3.msra.mxu0 %v469_v49 }
 0x1b9   :  { %v471_v50 = vpop.eup %470  ;;  %445 = vmatprep.subr.mxu0 %v499_v36 }
 0x1ba   :  { %446 = vmatpush3.msra.mxu0 %v471_v50  ;;  %v473_v51 = vpop.eup %472 }
 0x1bb   :  { %447 = vmatprep.subr.mxu0 %v499_v36  ;;  %v475_v53 = vpop.eup %474 }
 0x1bc   :  { %448 = vmatpush3.msra.mxu0 %v473_v51 }
 0x1bd   :  { %449 = vmatprep.subr.mxu0 %v499_v36 }
 0x1be   :  { %450 = vmatpush3.msra.mxu0 %v475_v53 }
 0x1bf   :  { %452 = vmatmul.mubr.msk.f32.vlgmr.msra.gmra.mxu0 %vm192_vm2, %v294_v52 }
 0x27f   :  { %v374_v59 = vpop.f32.mrf.mxu0 }
 0x280   :  { %v375_v60 = vadd.f32 %v374_v59, %v304_v58 }
 0x281   :  { %v453_v61 = vpop.f32.mrf.mxu0 }
 0x282   :  { %378 = vst [vmem:[#allocation3] sm:$0x1] %v375_v60 }
 0x283   :  { %487 = shalt.err (!%p484_p4)
}
 0x284   :  { %388 = dma.vmem_to_hbm [thread:$0]  %s386_s10, 16, %s618_s7, [#allocation4]  }
 0x285   :  { %496 = dma.done.wait [#allocation4], 16  }
 0x286   :  { %497 = vsyncadd [#allocation4], 4294967280 }
 0x287   :  { %392 = vsyncpa [#allocation4], 1 }

</bundles_post_ra>
